<compile_context>
chip_gen: v7x
topology: tpu7x:2x2x1
jax: 0.10.0
libtpu: 0.0.40
codegen_flags: <defaults>
</compile_context>

<pallas_src>
import jax
import jax.numpy as jnp
from jax.experimental import pallas as pl
from jax.experimental.pallas import tpu as pltpu


def _normalize_kernel(x_ref, m_ref, r_ref, o_ref):
    x = x_ref[...].astype(jnp.float32)   # (block_rows, cols)
    m = m_ref[...]                        # (block_rows, 1) or (1, cols), f32
    r = r_ref[...]                        # reciprocal of std, same shape as m
    o_ref[...] = ((x - m) * r).astype(o_ref.dtype)


def _row_tiled_normalize(x2, m2, r2, out_dtype, tile_bytes):
    """Normalize a 2-D slab x2 with broadcastable (mean, 1/std) operands."""
    rows, cols = x2.shape
    itemsize = jnp.dtype(x2.dtype).itemsize
    # Sublane multiple depends on dtype packing (f32: 8, bf16: 16, int8/fp8: 32).
    sub_mult = {4: 8, 2: 16, 1: 32}.get(itemsize, 8)

    # Largest row-block with ~tile_bytes per input tile; full extent if small.
    bytes_per_row = max(1, cols * itemsize)
    target_rows = max(1, tile_bytes // bytes_per_row)
    if target_rows >= rows:
        block_rows = rows                # full array extent -> always legal
    else:
        block_rows = max(sub_mult, (target_rows // sub_mult) * sub_mult)
    grid = (pl.cdiv(rows, block_rows),)  # ragged last tile masked by Pallas

    # mean/std operands: either one row per x-row (rows, 1) or a single
    # broadcast row (1, cols).
    if m2.shape[0] == 1:
        m_block = (1, m2.shape[1])
        m_index = lambda i: (0, 0)
    else:
        m_block = (block_rows, m2.shape[1])
        m_index = lambda i: (i, 0)

    return pl.pallas_call(
        _normalize_kernel,
        out_shape=jax.ShapeDtypeStruct((rows, cols), out_dtype),
        grid_spec=pltpu.PrefetchScalarGridSpec(
            num_scalar_prefetch=0,
            grid=grid,
            in_specs=[
                pl.BlockSpec((block_rows, cols), lambda i: (i, 0)),
                pl.BlockSpec(m_block, m_index),
                pl.BlockSpec(m_block, m_index),
            ],
            out_specs=pl.BlockSpec((block_rows, cols), lambda i: (i, 0)),
        ),
        compiler_params=pltpu.CompilerParams(
            dimension_semantics=("parallel",),
        ),
    )(x2, m2, r2)


def normalization(img, mean, std, *, tile_bytes=2 * 1024 * 1024):
    """Pallas implementation of Normalization.forward: (img - mean) / std."""
    squeeze_batch = False
    if img.ndim == 3:                    # (C, H, W) -> (1, C, H, W)
        img = img[None]
        squeeze_batch = True
    assert img.ndim == 4, "expected NCHW (or CHW) input"
    N, C, H, W = img.shape
    HW = H * W

    mean = jnp.asarray(mean, dtype=jnp.float32).reshape(-1)
    std = jnp.asarray(std, dtype=jnp.float32).reshape(-1)
    assert mean.shape[0] == C and std.shape[0] == C
    inv_std = 1.0 / std                  # tiny (C,) wrapper-side reciprocal

    if HW >= 128:
        # Lane-dense already: one (n, c) plane per row.
        rows = N * C
        x2 = img.reshape(rows, HW)
        m2 = jnp.tile(mean, N).reshape(rows, 1)
        r2 = jnp.tile(inv_std, N).reshape(rows, 1)
    else:
        # Small spatial dims: fold channels into lanes to keep output stores
        # unmasked (lane width C*HW instead of HW).
        x2 = img.reshape(N, C * HW)
        m2 = jnp.repeat(mean, HW).reshape(1, C * HW)
        r2 = jnp.repeat(inv_std, HW).reshape(1, C * HW)

    out2 = _row_tiled_normalize(x2, m2, r2, img.dtype, tile_bytes)

    out = out2.reshape(N, C, H, W)
    if squeeze_batch:
        out = out[0]
    return out


if __name__ == "__main__":
    key = jax.random.PRNGKey(0)

    # NCHW image batch + per-channel mean/std, as the PyTorch module expects.
    img = jax.random.uniform(key, (2, 4, 16, 16), dtype=jnp.float32)
    mean = jnp.array([0.485, 0.456, 0.406, 0.500], dtype=jnp.float32)
    std = jnp.array([0.229, 0.224, 0.225, 0.250], dtype=jnp.float32)

    out = normalization(img, mean, std)
    out = jax.block_until_ready(out)

    # Reference: PyTorch broadcast semantics (mean/std viewed as (C, 1, 1)).
    ref = (img - mean.reshape(1, -1, 1, 1)) / std.reshape(1, -1, 1, 1)
    assert out.shape == img.shape and out.dtype == img.dtype
    assert jnp.allclose(out, ref, rtol=1e-5, atol=1e-6), (
        float(jnp.max(jnp.abs(out - ref))))

    print("KERNEL_OK")
</pallas_src>

<mosaic_0001>
module attributes {stable_mosaic.version = 11 : i64} {
  func.func @_normalize_kernel(%arg0: i32, %arg1: memref<8x256xf32, #tpu.memory_space<vmem>>, %arg2: memref<8x1xf32, #tpu.memory_space<vmem>>, %arg3: memref<8x1xf32, #tpu.memory_space<vmem>>, %arg4: memref<8x256xf32, #tpu.memory_space<vmem>>) attributes {dimension_semantics = [#tpu.dimension_semantics<parallel>], iteration_bounds = array<i64: 1>, scalar_prefetch = 0 : i64, scratch_operands = 0 : i64, tpu.core_type = #tpu.core_type<tc>, window_params = [{transform_indices = @transform_0, window_bounds = array<i64: 8, 256>}, {transform_indices = @transform_1, window_bounds = array<i64: 8, 1>}, {transform_indices = @transform_2, window_bounds = array<i64: 8, 1>}, {transform_indices = @transform_3, window_bounds = array<i64: 8, 256>}]} {
    %c0 = arith.constant 0 : index
    %c0_0 = arith.constant 0 : index
    %0 = vector.load %arg1[%c0, %c0_0] : memref<8x256xf32, #tpu.memory_space<vmem>>, vector<8x256xf32>
    %c0_1 = arith.constant 0 : index
    %c0_2 = arith.constant 0 : index
    %1 = vector.load %arg2[%c0_1, %c0_2] : memref<8x1xf32, #tpu.memory_space<vmem>>, vector<8x1xf32>
    %c0_3 = arith.constant 0 : index
    %c0_4 = arith.constant 0 : index
    %2 = vector.load %arg3[%c0_3, %c0_4] : memref<8x1xf32, #tpu.memory_space<vmem>>, vector<8x1xf32>
    %3 = vector.broadcast %1 : vector<8x1xf32> to vector<8x256xf32>
    %4 = arith.subf %0, %3 : vector<8x256xf32>
    %5 = vector.broadcast %2 : vector<8x1xf32> to vector<8x256xf32>
    %6 = arith.mulf %4, %5 : vector<8x256xf32>
    %c0_5 = arith.constant 0 : index
    %c0_6 = arith.constant 0 : index
    %7 = vector.load %arg4[%c0_5, %c0_6] : memref<8x256xf32, #tpu.memory_space<vmem>>, vector<8x256xf32>
    tpu.vector_store %arg4[%c0_5, %c0_6], %6 {strides = array<i32>} : memref<8x256xf32, #tpu.memory_space<vmem>>, vector<8x256xf32>,
    return
  }
  func.func @transform_0(%arg0: i32) -> (i32, i32) {
    %c0_i32 = arith.constant 0 : i32
    %c0_i32_0 = arith.constant 0 : i32
    return %arg0, %c0_i32 : i32, i32
  }
  func.func @transform_1(%arg0: i32) -> (i32, i32) {
    %c0_i32 = arith.constant 0 : i32
    %c0_i32_0 = arith.constant 0 : i32
    return %arg0, %c0_i32 : i32, i32
  }
  func.func @transform_2(%arg0: i32) -> (i32, i32) {
    %c0_i32 = arith.constant 0 : i32
    %c0_i32_0 = arith.constant 0 : i32
    return %arg0, %c0_i32 : i32, i32
  }
  func.func @transform_3(%arg0: i32) -> (i32, i32) {
    %c0_i32 = arith.constant 0 : i32
    %c0_i32_0 = arith.constant 0 : i32
    return %arg0, %c0_i32 : i32, i32
  }
}

</mosaic_0001>

<bundles_post_ra>
// kernel: tpu_custom_call.1
= control target key start
LH: loop header
LB: loop body
LE: loop exit
PB: predicated region body
PF: predicated region fallthrough
CT: control target
= control target key end

     0   :  { %s122_s0 = inlined_call_operand.vmem [shape: f32[8,256], index: 0, kind: input, shape index: {}]   ;;  %s123_s1 = inlined_call_operand.vmem [shape: f32[8,1], index: 1, kind: input, shape index: {}]   ;;  %s124_s2 = inlined_call_operand.vmem [shape: f32[8,1], index: 2, kind: input, shape index: {}]   ;;  %s125_s3 = inlined_call_operand.hbm [shape: f32[8,256], index: 3, kind: output, shape index: {}]  }
   0x1   :  { %v17_v0 = vld [vmem:[%s123_s1] sm:$0xff] }
   0x2   :  { %8 = vsyncpa [#allocation3], 0  ;;  %v76_v1 = vmov 0   ;;  %v18_v2 = vld [vmem:[%s124_s2] sm:$0xff]  ;;  %v16_v5 = vld [vmem:[%s122_s0 + $0x8] sm:$0xff]  ;;  %s77_s20 = smov [#allocation2]  }
   0x3   :  { %51 = vset.pattern.permute.xlu0 %v76_v1  ;;  %v15_v4 = vld [vmem:[%s122_s0] sm:$0xff]  ;;  %s41_s1 = sshll.u32 %s77_s20, 4  ;;  %s42_s1 = int_to_ptr.vmem [resolvable:$true] %s41_s1 }
   0x4   :  { %21 = vperm.xlu0 %51, %v17_v0   ;;  %s52_s2 = scalar_lea.vmem %s42_s1, 256  ;;  %p57_p1 = scmp.lt.s32.totalorder %s42_s1, %s42_s1 }
   0x5   :  { %p53_p0 = scmp.ne.s32.totalorder %s42_s1, %s52_s2  ;;  %p58_p2 = scmp.lt.s32.totalorder %s52_s2, %s52_s2 }
   0x7   :  { %p59_p3 = por %p58_p2, %p57_p1 }
   0x8   :  { %28 = vperm.xlu0 %51, %v18_v2  }
   0x9   :  { %p60_p4 = pnand %p59_p3, %p53_p0 }
  0x83   :  { %v22_v3 = vpop.permute.xlu0 %21 }
  0x84   :  { %v24_v6 = vsub.f32 %v15_v4, %v22_v3  ;;  %v25_v7 = vsub.f32 %v16_v5, %v22_v3 }
  0x87   :  { %v29_v8 = vpop.permute.xlu0 %28 }
  0x88   :  { %v31_v9 = vmul.f32 %v29_v8, %v24_v6  ;;  %v32_v10 = vmul.f32 %v29_v8, %v25_v7 }
  0x8a   :  { %33 = vst [vmem:[#allocation2] sm:$0xff] %v31_v9  ;;  %34 = vst [vmem:[#allocation2 + $0x8] sm:$0xff] %v32_v10 }
  0x8b   :  { %63 = shalt.err (!%p60_p4)
}
  0x8c   :  { %s64_s0 = scalar_lea.hbm %s125_s3, 256 }
  0x8d   :  { %p65_p5 = scmp.ne.s32.totalorder %s125_s3, %s64_s0  ;;  %p68_p6 = scmp.lt.u32.totalorder %s64_s0, %s125_s3 }
  0x8f   :  { %p70_p7 = pnand %p68_p6, %p65_p5 }
  0x91   :  { %73 = shalt.err (!%p70_p7)
}
  0x92   :  { %44 = dma.vmem_to_hbm [thread:$0]  %s42_s1, 256, %s125_s3, [#allocation3]  }
  0x93   :  { %74 = dma.done.wait [#allocation3], 256  }
  0x94   :  { %75 = vsyncadd [#allocation3], 4294967040 }
  0x95   :  { %48 = vsyncpa [#allocation3], 1 }

</bundles_post_ra>
